<compile_context>
chip_gen: v6e
topology: v6e:2x2x1
jax: 0.10.0
libtpu: 0.0.40
codegen_flags: <defaults>
</compile_context>

<pallas_src>
import functools

import jax
import jax.numpy as jnp
from jax.experimental import pallas as pl
from jax.experimental.pallas import tpu as pltpu


def _make_vreg_kernel(matmul_dtype):
    """Build the fused kernel; matmul operands cast to `matmul_dtype`."""

    def vreg_kernel(x_ref, w_mu_ref, eps_ref, z_ref, w_sampled_ref, acc_ref):
        k = pl.program_id(1)  # reduction (in_size) axis, innermost

        @pl.when(k == 0)
        def _init():
            acc_ref[...] = jnp.zeros_like(acc_ref)

        # Elementwise reparameterization in f32 (v5e-friendly).
        w_mu = w_mu_ref[...]
        # NOTE: torch module reuses encoder_mu.weight for W_logvar, so
        # sigma = exp(0.5 * W_mu) — upstream behaviour intentionally kept.
        sigma = jnp.exp(0.5 * w_mu)
        w_sampled = eps_ref[...] * sigma + w_mu

        # This (k, n) tile of W_sampled is owned by exactly this grid slice:
        # write it once, no re-writes across the reduction axis.
        w_sampled_ref[...] = w_sampled.astype(w_sampled_ref.dtype)

        # MXU matmul with f32 accumulation in VMEM scratch.
        acc_ref[...] += jnp.dot(
            x_ref[...].astype(matmul_dtype),
            w_sampled.astype(matmul_dtype),
            preferred_element_type=jnp.float32,
        )

        @pl.when(k == pl.num_programs(1) - 1)
        def _finalize():
            z_ref[...] = acc_ref[...].astype(z_ref.dtype)

    return vreg_kernel


def _pick_tile(dim, target=512, align=128):
    """Largest multiple of `align` that divides `dim` and is <= target.

    Falls back to the full dimension (whole-array block) for small or
    non-aligned sizes — full-extent blocks are exempt from the (8,128) rule.
    """
    if dim <= target:
        return dim
    t = (target // align) * align
    while t >= align:
        if dim % t == 0:
            return t
        t -= align
    return dim


def vreg_forward(x, weight_mu, eps, *, tile_n=512, tile_k=512, matmul_dtype=None):
    """JAX wrapper reproducing VReg.forward.

    x         : (B, in_size)         float32
    weight_mu : (out_size, in_size)  float32 (nn.Linear weight of encoder_mu)
    eps       : (in_size, out_size)  float32 standard-normal noise
    matmul_dtype : optional dtype for MXU operands (e.g. jnp.bfloat16 on
                   v6e/v7x); default keeps x.dtype (f32) for tight accuracy.
    returns (z, W_mu, W_logvar, W_sampled)
    """
    B, in_size = x.shape
    out_size = weight_mu.shape[0]
    assert eps.shape == (in_size, out_size)

    # Single transpose; the same array is fed to the kernel and returned as
    # both W_mu and W_logvar (matching torch, where both are the same data).
    W_mu = weight_mu.T  # (in_size, out_size)

    tk = _pick_tile(in_size, tile_k)
    tn = _pick_tile(out_size, tile_n)
    grid = (out_size // tn, in_size // tk)  # (N parallel, K arbitrary/innermost)

    mm_dtype = x.dtype if matmul_dtype is None else matmul_dtype
    itemsize = x.dtype.itemsize

    cost = pl.CostEstimate(
        flops=2 * B * in_size * out_size,
        transcendentals=in_size * out_size,
        bytes_accessed=(
            (x.size + W_mu.size + eps.size) * itemsize          # reads
            + (B * out_size + in_size * out_size) * itemsize    # writes
        ),
    )

    z, W_sampled = pl.pallas_call(
        _make_vreg_kernel(mm_dtype),
        grid_spec=pltpu.PrefetchScalarGridSpec(
            num_scalar_prefetch=0,
            grid=grid,
            in_specs=[
                pl.BlockSpec((B, tk), lambda n, k: (0, k)),      # x
                pl.BlockSpec((tk, tn), lambda n, k: (k, n)),     # W_mu (single copy)
                pl.BlockSpec((tk, tn), lambda n, k: (k, n)),     # eps
            ],
            out_specs=(
                pl.BlockSpec((B, tn), lambda n, k: (0, n)),      # z (resident over k)
                pl.BlockSpec((tk, tn), lambda n, k: (k, n)),     # W_sampled
            ),
            scratch_shapes=[pltpu.VMEM((B, tn), jnp.float32)],   # z accumulator
        ),
        out_shape=(
            jax.ShapeDtypeStruct((B, out_size), x.dtype),
            jax.ShapeDtypeStruct((in_size, out_size), x.dtype),
        ),
        compiler_params=pltpu.CompilerParams(
            dimension_semantics=("parallel", "arbitrary"),
        ),
        cost_estimate=cost,
    )(x, W_mu, eps)

    W_logvar = W_mu  # same tensor data as in the torch module

    # TODO(synk): mu = x @ W_mu and logvar = x @ W_logvar are computed in the
    # torch forward but never used or returned, so they are omitted here.
    return z, W_mu, W_logvar, W_sampled


if __name__ == "__main__":
    B, in_size, out_size = 8, 32, 16

    key = jax.random.PRNGKey(0)
    k_x, k_w, k_eps = jax.random.split(key, 3)

    # Deterministic synthetic inputs (nn.Linear weight shape: (out, in)).
    x = jax.random.normal(k_x, (B, in_size), dtype=jnp.float32)
    weight_mu = jax.random.normal(k_w, (out_size, in_size), dtype=jnp.float32) * 0.1
    eps = jax.random.normal(k_eps, (in_size, out_size), dtype=jnp.float32)

    fwd = jax.jit(functools.partial(vreg_forward))
    z, W_mu, W_logvar, W_sampled = jax.block_until_ready(fwd(x, weight_mu, eps))

    # Reference check in plain JAX (f32 path, tight tolerances).
    W_mu_ref = weight_mu.T
    W_sampled_ref = eps * jnp.exp(0.5 * W_mu_ref) + W_mu_ref
    z_ref = x @ W_sampled_ref

    assert jnp.allclose(W_mu, W_mu_ref, atol=1e-6, rtol=1e-6)
    assert jnp.allclose(W_logvar, W_mu_ref, atol=1e-6, rtol=1e-6)
    assert jnp.allclose(W_sampled, W_sampled_ref, atol=1e-5, rtol=1e-5)
    assert jnp.allclose(z, z_ref, atol=1e-4, rtol=1e-4)
    assert z.shape == (B, out_size)
    assert W_mu.shape == (in_size, out_size)
    assert W_sampled.shape == (in_size, out_size)

    print("KERNEL_OK")
</pallas_src>

<mosaic_0001>
module attributes {stable_mosaic.version = 11 : i64} {
  func.func @vreg_kernel(%arg0: i32, %arg1: i32, %arg2: memref<8x32xf32, #tpu.memory_space<vmem>>, %arg3: memref<32x16xf32, #tpu.memory_space<vmem>>, %arg4: memref<32x16xf32, #tpu.memory_space<vmem>>, %arg5: memref<8x16xf32, #tpu.memory_space<vmem>>, %arg6: memref<32x16xf32, #tpu.memory_space<vmem>>, %arg7: memref<8x16xf32, #tpu.memory_space<vmem>>) attributes {dimension_semantics = [#tpu.dimension_semantics<parallel>, #tpu.dimension_semantics<arbitrary>], iteration_bounds = array<i64: 1, 1>, scalar_prefetch = 0 : i64, scratch_operands = 1 : i64, tpu.core_type = #tpu.core_type<tc>, window_params = [{transform_indices = @transform_0, window_bounds = array<i64: 8, 32>}, {transform_indices = @transform_1, window_bounds = array<i64: 32, 16>}, {transform_indices = @transform_2, window_bounds = array<i64: 32, 16>}, {transform_indices = @transform_3, window_bounds = array<i64: 8, 16>}, {transform_indices = @transform_4, window_bounds = array<i64: 32, 16>}]} {
    %c0_i32 = arith.constant 0 : i32
    %0 = arith.cmpi eq, %arg1, %c0_i32 : i32
    %1 = arith.extui %0 : i1 to i32
    %c0_i32_0 = arith.constant 0 : i32
    %2 = arith.cmpi ne, %1, %c0_i32_0 : i32
    scf.if %2 {
      %cst_15 = arith.constant 0.000000e+00 : f32
      %19 = vector.broadcast %cst_15 : f32 to vector<8x16xf32>
      %c0_16 = arith.constant 0 : index
      %c0_17 = arith.constant 0 : index
      %20 = vector.load %arg7[%c0_16, %c0_17] : memref<8x16xf32, #tpu.memory_space<vmem>>, vector<8x16xf32>
      tpu.vector_store %arg7[%c0_16, %c0_17], %19 {strides = array<i32>} : memref<8x16xf32, #tpu.memory_space<vmem>>, vector<8x16xf32>,
    } else {
    }
    %c0 = arith.constant 0 : index
    %c0_1 = arith.constant 0 : index
    %3 = vector.load %arg3[%c0, %c0_1] : memref<32x16xf32, #tpu.memory_space<vmem>>, vector<32x16xf32>
    %cst = arith.constant 5.000000e-01 : f32
    %4 = vector.broadcast %cst : f32 to vector<32x16xf32>
    %5 = arith.mulf %4, %3 : vector<32x16xf32>
    %6 = math.exp %5 : vector<32x16xf32>
    %c0_2 = arith.constant 0 : index
    %c0_3 = arith.constant 0 : index
    %7 = vector.load %arg4[%c0_2, %c0_3] : memref<32x16xf32, #tpu.memory_space<vmem>>, vector<32x16xf32>
    %8 = arith.mulf %7, %6 : vector<32x16xf32>
    %9 = arith.addf %8, %3 : vector<32x16xf32>
    %c0_4 = arith.constant 0 : index
    %c0_5 = arith.constant 0 : index
    %10 = vector.load %arg6[%c0_4, %c0_5] : memref<32x16xf32, #tpu.memory_space<vmem>>, vector<32x16xf32>
    tpu.vector_store %arg6[%c0_4, %c0_5], %9 {strides = array<i32>} : memref<32x16xf32, #tpu.memory_space<vmem>>, vector<32x16xf32>,
    %c0_6 = arith.constant 0 : index
    %c0_7 = arith.constant 0 : index
    %11 = vector.load %arg7[%c0_6, %c0_7] : memref<8x16xf32, #tpu.memory_space<vmem>>, vector<8x16xf32>
    %c0_8 = arith.constant 0 : index
    %c0_9 = arith.constant 0 : index
    %12 = vector.load %arg2[%c0_8, %c0_9] : memref<8x32xf32, #tpu.memory_space<vmem>>, vector<8x32xf32>
    %cst_10 = arith.constant dense<0.000000e+00> : vector<8x16xf32>
    %13 = tpu.matmul %12, %9, %cst_10 {dimension_numbers = #tpu.dot_dimension_numbers<[1], [0], [0], [1], [0, 0, 1, 1], [], []>} : vector<8x32xf32>, vector<32x16xf32>, vector<8x16xf32> -> vector<8x16xf32>
    %14 = arith.addf %11, %13 : vector<8x16xf32>
    %c0_11 = arith.constant 0 : index
    %c0_12 = arith.constant 0 : index
    %15 = vector.load %arg7[%c0_11, %c0_12] : memref<8x16xf32, #tpu.memory_space<vmem>>, vector<8x16xf32>
    tpu.vector_store %arg7[%c0_11, %c0_12], %14 {strides = array<i32>} : memref<8x16xf32, #tpu.memory_space<vmem>>, vector<8x16xf32>,
    %c0_i32_13 = arith.constant 0 : i32
    %16 = arith.cmpi eq, %arg1, %c0_i32_13 : i32
    %17 = arith.extui %16 : i1 to i32
    %c0_i32_14 = arith.constant 0 : i32
    %18 = arith.cmpi ne, %17, %c0_i32_14 : i32
    scf.if %18 {
      %c0_15 = arith.constant 0 : index
      %c0_16 = arith.constant 0 : index
      %19 = vector.load %arg7[%c0_15, %c0_16] : memref<8x16xf32, #tpu.memory_space<vmem>>, vector<8x16xf32>
      %c0_17 = arith.constant 0 : index
      %c0_18 = arith.constant 0 : index
      %20 = vector.load %arg5[%c0_17, %c0_18] : memref<8x16xf32, #tpu.memory_space<vmem>>, vector<8x16xf32>
      tpu.vector_store %arg5[%c0_17, %c0_18], %19 {strides = array<i32>} : memref<8x16xf32, #tpu.memory_space<vmem>>, vector<8x16xf32>,
    } else {
    }
    return
  }
  func.func @transform_0(%arg0: i32, %arg1: i32) -> (i32, i32) {
    %c0_i32 = arith.constant 0 : i32
    %c0_i32_0 = arith.constant 0 : i32
    return %c0_i32, %arg1 : i32, i32
  }
  func.func @transform_1(%arg0: i32, %arg1: i32) -> (i32, i32) {
    %c0_i32 = arith.constant 0 : i32
    return %arg1, %arg0 : i32, i32
  }
  func.func @transform_2(%arg0: i32, %arg1: i32) -> (i32, i32) {
    %c0_i32 = arith.constant 0 : i32
    return %arg1, %arg0 : i32, i32
  }
  func.func @transform_3(%arg0: i32, %arg1: i32) -> (i32, i32) {
    %c0_i32 = arith.constant 0 : i32
    %c0_i32_0 = arith.constant 0 : i32
    return %c0_i32, %arg0 : i32, i32
  }
  func.func @transform_4(%arg0: i32, %arg1: i32) -> (i32, i32) {
    %c0_i32 = arith.constant 0 : i32
    return %arg1, %arg0 : i32, i32
  }
}

</mosaic_0001>

<bundles_post_ra>
// kernel: vreg_forward.1
= control target key start
LH: loop header
LB: loop body
LE: loop exit
PB: predicated region body
PF: predicated region fallthrough
CT: control target
= control target key end

     0   :  { %vm21_vm0 = vcmask 130048   ;;  %v207_v2 = vmov 0.0   ;;  %vm208_vm1 = vmmov 0   ;;  %s284_s0 = inlined_call_operand.vmem [shape: f32[8,32], index: 0, kind: input, shape index: {}]   ;;  %s285_s1 = inlined_call_operand.vmem [shape: f32[32,16], index: 1, kind: input, shape index: {}]   ;;  %s286_s2 = inlined_call_operand.vmem [shape: f32[32,16], index: 2, kind: input, shape index: {}]   ;;  %s287_s3 = inlined_call_operand.hbm [shape: f32[8,16], index: 3, kind: output, shape index: {0}]   ;;  %s288_s4 = inlined_call_operand.vmem [shape: f32[32,16], index: 4, kind: output, shape index: {1}]  }
   0x1   :  { %v26_v0 = vld [vmem:[%s285_s1 + $0x18] sm:$0xff]  ;;  %v25_v1 = vld [vmem:[%s285_s1 + $0x10] sm:$0xff]  ;;  %163 = vmatprep.subr.mxu0 %v207_v2  ;;  %22 = vst.msk [vmem:[#allocation2] sm:$0xff] %vm21_vm0, %v207_v2  ;;  %v24_v5 = vld [vmem:[%s285_s1 + $0x8] sm:$0xff]  ;;  %171 = vmatprep.mubr.msk.f32.mxu0 %vm208_vm1, %v207_v2 }
   0x2   :  { %v30_v3 = vmul.f32 0.5, %v26_v0  ;;  %v29_v4 = vmul.f32 0.5, %v25_v1  ;;  %v28_v6 = vmul.f32 0.5, %v24_v5  ;;  %v23_v7 = vld [vmem:[%s285_s1] sm:$0xff] }
   0x3   :  { %v27_v10 = vmul.f32 0.5, %v23_v7 }
   0x4   :  { %v37_v8 = vmul.f32 1.442695, %v30_v3  ;;  %v35_v9 = vmul.f32 1.442695, %v29_v4  ;;  %v33_v11 = vmul.f32 1.442695, %v28_v6 }
   0x5   :  { %10 = vsyncpa [#allocation4], 0  ;;  %v31_v12 = vmul.f32 1.442695, %v27_v10  ;;  %v42_v13 = vld [vmem:[%s286_s2 + $0x18] sm:$0xff]  ;;  %v41_v14 = vld [vmem:[%s286_s2 + $0x10] sm:$0xff] }
   0x6   :  { %177 = vpow2.f32 %v37_v8  ;;  %v40_v16 = vld [vmem:[%s286_s2 + $0x8] sm:$0xff]  ;;  %v39_v19 = vld [vmem:[%s286_s2] sm:$0xff]  ;;  %vm58_vm2 = vcmask 261120   ;;  %s209_s13 = smov [#allocation3]  }
   0x7   :  { %179 = vpow2.f32 %v35_v9  ;;  %v57_v29 = vld [vmem:[%s284_s0] sm:$0xff]  ;;  %s145_s14 = sshll.u32 %s209_s13, 4  ;;  %s146_s14 = int_to_ptr.vmem [resolvable:$true] %s145_s14 }
   0x8   :  { %181 = vpow2.f32 %v33_v11  ;;  %v56_v30 = vld [vmem:[#allocation2] sm:$0xff]  ;;  %p190_p1 = scmp.lt.s32.totalorder %s146_s14, %s146_s14 }
   0x9   :  { %183 = vpow2.f32 %v31_v12 }
  0x13   :  { %v178_v15 = vpop.eup %177 }
  0x14   :  { %v180_v17 = vpop.eup %179  ;;  %v46_v18 = vmul.f32 %v178_v15, %v42_v13 }
  0x15   :  { %v182_v20 = vpop.eup %181  ;;  %v45_v21 = vmul.f32 %v180_v17, %v41_v14 }
  0x16   :  { %v184_v22 = vpop.eup %183  ;;  %v50_v23 = vadd.f32 %v46_v18, %v26_v0  ;;  %v44_v24 = vmul.f32 %v182_v20, %v40_v16 }
  0x17   :  { %v49_v25 = vadd.f32 %v45_v21, %v25_v1  ;;  %v43_v26 = vmul.f32 %v184_v22, %v39_v19 }
  0x18   :  { %55 = vst.msk [vmem:[%s288_s4 + $0x18] sm:$0xff] %vm21_vm0, %v50_v23  ;;  %164 = vmatpush3.msra.mxu0 %v50_v23  ;;  %v48_v27 = vadd.f32 %v44_v24, %v24_v5 }
  0x19   :  { %165 = vmatprep.subr.mxu0 %v207_v2  ;;  %54 = vst.msk [vmem:[%s288_s4 + $0x10] sm:$0xff] %vm21_vm0, %v49_v25  ;;  %v47_v28 = vadd.f32 %v43_v26, %v23_v7 }
  0x1a   :  { %166 = vmatpush3.msra.mxu0 %v49_v25  ;;  %53 = vst.msk [vmem:[%s288_s4 + $0x8] sm:$0xff] %vm21_vm0, %v48_v27 }
  0x1b   :  { %167 = vmatprep.subr.mxu0 %v207_v2  ;;  %52 = vst.msk [vmem:[%s288_s4] sm:$0xff] %vm21_vm0, %v47_v28  ;;  %s185_s4 = scalar_lea.vmem %s146_s14, 128 }
  0x1c   :  { %168 = vmatpush3.msra.mxu0 %v48_v27  ;;  %p186_p0 = scmp.ne.s32.totalorder %s146_s14, %s185_s4  ;;  %p191_p2 = scmp.lt.s32.totalorder %s185_s4, %s185_s4 }
  0x1d   :  { %169 = vmatprep.subr.mxu0 %v207_v2 }
  0x1e   :  { %170 = vmatpush3.msra.mxu0 %v47_v28  ;;  %p192_p3 = por %p191_p2, %p190_p1 }
  0x1f   :  { %172 = vmatmul.mubr.msk.f32.vlgmr.msra.gmra.mxu0 %vm58_vm2, %v57_v29 }
  0x20   :  { %p193_p4 = pnand %p192_p3, %p186_p0 }
  0xdf   :  { %v128_v31 = vpop.f32.mrf.mxu0 }
  0xe0   :  { %v132_v32 = vadd.f32 %v128_v31, %v56_v30 }
  0xe1   :  { %v173_v33 = vpop.f32.mrf.mxu0 }
  0xe2   :  { %133 = vst.msk [vmem:[#allocation2] sm:$0xff] %vm21_vm0, %v132_v32 }
  0xe9   :  { %v137_v34 = vld [vmem:[#allocation2] sm:$0xff] }
  0xea   :  { %138 = vst.msk [vmem:[#allocation3] sm:$0xff] %vm21_vm0, %v137_v34 }
  0xeb   :  { %196 = shalt.err (!%p193_p4)
}
  0xec   :  { %148 = dma.vmem_to_hbm [thread:$0]  %s146_s14, 128, %s287_s3, [#allocation4]  }
  0xed   :  { %205 = dma.done.wait [#allocation4], 128  }
  0xee   :  { %206 = vsyncadd [#allocation4], 4294967168 }
  0xef   :  { %156 = vsyncpa [#allocation4], 1 }

</bundles_post_ra>
